<compile_context>
chip_gen: v7x
topology: tpu7x:2x2x1
jax: 0.10.0
libtpu: 0.0.40
codegen_flags: <defaults>
</compile_context>

<pallas_src>
import jax
import jax.numpy as jnp
from jax.experimental import pallas as pl
from jax.experimental.pallas import tpu as pltpu


def _cls_pred_kernel(x_ref, w1_ref, b1_ref, c_ref, consts_ref, o_ref):
    # x_ref : (tm, D_in)  streamed tile (bf16 or f32)
    # w1_ref: (D_in, H)   resident weight, same dtype as x
    # b1_ref: (1, H) f32  Linear bias
    # c_ref : (1, H) f32  gamma * w2  (LN-affine + H->1 projection folded together)
    # consts_ref: (2,) f32 in SMEM: [sum(c), dot(beta, w2) + b2]
    # o_ref : (1, tm) f32 lane-dense output block
    h = jnp.dot(x_ref[...], w1_ref[...], preferred_element_type=jnp.float32)
    h = jnp.maximum(h + b1_ref[...], 0.0)                      # ReLU(Linear)

    inv_h = 1.0 / h.shape[-1]
    # pass 1: row sums of h and h*c (h stays in vregs/VMEM, read twice total)
    s_h = jnp.sum(h, axis=-1, keepdims=True)                   # (tm, 1)
    s_hc = jnp.sum(h * c_ref[...], axis=-1, keepdims=True)     # (tm, 1)
    mu = s_h * inv_h
    # pass 2: centered second moment (two-pass, numerically robust, biased variance)
    d = h - mu
    var = jnp.sum(d * d, axis=-1, keepdims=True) * inv_h
    inv_std = jax.lax.rsqrt(var + 1e-12)                       # BertLayerNorm eps

    sum_c = consts_ref[0]
    k = consts_ref[1]                                          # beta.w2 + b2
    score = inv_std * (s_hc - mu * sum_c) + k                  # (tm, 1)
    o_ref[...] = score.reshape(o_ref.shape).astype(o_ref.dtype)


def _pick_tm(m, tm_max=512):
    """Row-tile size. Lane-dense (1, tm) output blocks need tm % 128 == 0 unless tm == M."""
    if m < 128:
        return m                      # single full block (block dim == array dim is allowed)
    # Prefer >= 2 grid steps so ("parallel",) can shard across v7x's two TensorCores.
    for tm in (tm_max, 256, 128):
        if tm <= tm_max and m >= 2 * tm:
            return tm
    return 128


def cls_prediction(x, w1, b1, gamma, beta, w2, b2, *,
                   matmul_dtype=jnp.bfloat16, tm_max=512):
    """x: (B, L, D_in) -> (B, L, 1) float32 logits.
    w1: (D_in, H), b1: (H,), gamma/beta: (H,), w2: (H, 1), b2: (1,)."""
    B, L, D_in = x.shape
    H = w1.shape[1]
    M = B * L
    tm = _pick_tm(M, tm_max)
    grid_m = pl.cdiv(M, tm)

    mm_dtype = jnp.dtype(matmul_dtype) if matmul_dtype is not None else x.dtype
    x2 = x.reshape(M, D_in).astype(mm_dtype)   # bf16 halves the streamed HBM traffic
    w1c = w1.astype(mm_dtype)                  # match dtypes -> fast MXU path, no f32 promote

    # Fold LayerNorm affine + Linear(H, 1) into the reductions (all f32).
    w2_row = w2.reshape(H).astype(jnp.float32)
    b1_2 = b1.reshape(1, H).astype(jnp.float32)
    c_2 = (gamma.astype(jnp.float32) * w2_row).reshape(1, H)
    consts = jnp.stack([
        jnp.sum(c_2),
        jnp.dot(beta.astype(jnp.float32), w2_row) + b2.reshape(()).astype(jnp.float32),
    ])

    itemsize = jnp.dtype(mm_dtype).itemsize
    cost = pl.CostEstimate(
        flops=2 * M * D_in * H + 8 * M * H,
        transcendentals=M,
        bytes_accessed=M * D_in * itemsize + D_in * H * itemsize + (2 * H + 2) * 4 + M * 4,
    )

    def _build(use_pipeline_mode):
        def spec(shape, imap, mode):
            if use_pipeline_mode and mode is not None:
                return pl.BlockSpec(shape, imap, pipeline_mode=mode)
            return pl.BlockSpec(shape, imap)

        # Streamed x: deepen buffering only when there are enough steps to benefit (v5e).
        x_mode = pl.Buffered(3) if (use_pipeline_mode and grid_m >= 3) else None
        # Constant-index params: drop the dead second buffer.
        p_mode = pl.Buffered(1) if use_pipeline_mode else None

        return pl.pallas_call(
            _cls_pred_kernel,
            out_shape=jax.ShapeDtypeStruct((1, M), jnp.float32),
            grid_spec=pltpu.PrefetchScalarGridSpec(
                num_scalar_prefetch=0,
                grid=(grid_m,),
                in_specs=[
                    spec((tm, D_in), lambda i: (i, 0), x_mode),          # x row tile (streamed)
                    spec((D_in, H), lambda i: (0, 0), p_mode),           # W1 (resident)
                    spec((1, H), lambda i: (0, 0), p_mode),              # b1
                    spec((1, H), lambda i: (0, 0), p_mode),              # c = gamma * w2
                    pl.BlockSpec(memory_space=pltpu.MemorySpace.SMEM),   # [sum(c), beta.w2+b2]
                ],
                out_specs=pl.BlockSpec((1, tm), lambda i: (0, i)),       # lane-dense output row
            ),
            compiler_params=pltpu.CompilerParams(
                dimension_semantics=("parallel",),
                vmem_limit_bytes=48 * 1024 * 1024,   # safe on v5e/v6e (128 MiB) and v7x (64 MiB)
            ),
            cost_estimate=cost,
        )

    args = (x2, w1c, b1_2, c_2, consts)
    try:
        out_row = _build(True)(*args)
    except Exception:
        # Fallback for JAX builds without BlockSpec.pipeline_mode / Buffered(1) support.
        out_row = _build(False)(*args)

    # Torch's Linear(H, 1) with f32 params yields f32 logits.
    return out_row.reshape(B, L, 1)


if __name__ == "__main__":
    # Small shapes consistent with the module: batch=2, seq=8, hidden=32 (input_size=hidden).
    B, L, H = 2, 8, 32
    D_in = H

    key = jax.random.PRNGKey(0)
    kx, kw1, kb1, kw2, kb2 = jax.random.split(key, 5)

    x = jax.random.normal(kx, (B, L, D_in), dtype=jnp.float32)
    w1 = jax.random.normal(kw1, (D_in, H), dtype=jnp.float32) * 0.05
    b1 = jax.random.normal(kb1, (H,), dtype=jnp.float32) * 0.01
    gamma = jnp.ones((H,), dtype=jnp.float32)
    beta = jnp.zeros((H,), dtype=jnp.float32)
    w2 = jax.random.normal(kw2, (H, 1), dtype=jnp.float32) * 0.05
    b2 = jax.random.normal(kb2, (1,), dtype=jnp.float32) * 0.01

    out = cls_prediction(x, w1, b1, gamma, beta, w2, b2)
    out = jax.block_until_ready(out)
    assert out.shape == (B, L, 1)

    def reference(xx, mm_dtype):
        x2 = xx.reshape(-1, D_in)
        h = jnp.dot(x2.astype(mm_dtype), w1.astype(mm_dtype),
                    preferred_element_type=jnp.float32) + b1
        h = jnp.maximum(h, 0.0)
        mu = jnp.mean(h, axis=-1, keepdims=True)
        var = jnp.mean((h - mu) ** 2, axis=-1, keepdims=True)
        hn = (h - mu) / jnp.sqrt(var + 1e-12)
        hn = hn * gamma + beta
        return (hn @ w2 + b2).reshape(B, L, 1)

    # Tight check vs a reference that mirrors the kernel's bf16 matmul.
    ref_bf16 = reference(x, jnp.bfloat16)
    assert jnp.allclose(out, ref_bf16, atol=1e-3, rtol=1e-3), "mismatch vs mirrored reference"
    # Loose check vs the pure-f32 torch-equivalent reference (bf16 matmul error budget).
    ref_f32 = reference(x, jnp.float32)
    assert jnp.allclose(out, ref_f32, atol=3e-2, rtol=3e-2), "mismatch vs f32 reference"

    print("KERNEL_OK")
</pallas_src>

<mosaic_0001>
module attributes {stable_mosaic.version = 11 : i64} {
  func.func @_cls_pred_kernel(%arg0: i32, %arg1: memref<16x32xbf16, #tpu.memory_space<vmem>>, %arg2: memref<32x32xbf16, #tpu.memory_space<vmem>>, %arg3: memref<1x32xf32, #tpu.memory_space<vmem>>, %arg4: memref<1x32xf32, #tpu.memory_space<vmem>>, %arg5: memref<2xf32, #tpu.memory_space<smem>>, %arg6: memref<1x16xf32, #tpu.memory_space<vmem>>) attributes {dimension_semantics = [#tpu.dimension_semantics<parallel>], iteration_bounds = array<i64: 1>, scalar_prefetch = 0 : i64, scratch_operands = 0 : i64, tpu.core_type = #tpu.core_type<tc>, window_params = [{transform_indices = @transform_0, window_bounds = array<i64: 16, 32>}, {pipeline_mode = #tpu.pipeline_mode<synchronous>, transform_indices = @transform_1, window_bounds = array<i64: 32, 32>}, {pipeline_mode = #tpu.pipeline_mode<synchronous>, transform_indices = @transform_2, window_bounds = array<i64: 1, 32>}, {pipeline_mode = #tpu.pipeline_mode<synchronous>, transform_indices = @transform_3, window_bounds = array<i64: 1, 32>}, {transform_indices = @transform_4, window_bounds = array<i64: 2>}, {transform_indices = @transform_5, window_bounds = array<i64: 1, 16>}]} {
    %c0 = arith.constant 0 : index
    %c0_0 = arith.constant 0 : index
    %0 = vector.load %arg1[%c0, %c0_0] : memref<16x32xbf16, #tpu.memory_space<vmem>>, vector<16x32xbf16>
    %c0_1 = arith.constant 0 : index
    %c0_2 = arith.constant 0 : index
    %1 = vector.load %arg2[%c0_1, %c0_2] : memref<32x32xbf16, #tpu.memory_space<vmem>>, vector<32x32xbf16>
    %cst = arith.constant dense<0.000000e+00> : vector<16x32xf32>
    %2 = tpu.matmul %0, %1, %cst {dimension_numbers = #tpu.dot_dimension_numbers<[1], [0], [0], [1], [0, 0, 1, 1], [], []>} : vector<16x32xbf16>, vector<32x32xbf16>, vector<16x32xf32> -> vector<16x32xf32>
    %c0_3 = arith.constant 0 : index
    %c0_4 = arith.constant 0 : index
    %3 = vector.load %arg3[%c0_3, %c0_4] : memref<1x32xf32, #tpu.memory_space<vmem>>, vector<1x32xf32>
    %4 = vector.broadcast %3 : vector<1x32xf32> to vector<16x32xf32>
    %5 = arith.addf %2, %4 : vector<16x32xf32>
    %cst_5 = arith.constant 0.000000e+00 : f32
    %6 = vector.broadcast %cst_5 : f32 to vector<16x32xf32>
    %7 = arith.maximumf %5, %6 : vector<16x32xf32>
    %cst_6 = arith.constant dense<0.000000e+00> : vector<16xf32>
    %8 = vector.multi_reduction <add>, %7, %cst_6 [1] : vector<16x32xf32> to vector<16xf32>
    %9 = vector.shape_cast %8 : vector<16xf32> to vector<16x1xf32>
    %c0_7 = arith.constant 0 : index
    %c0_8 = arith.constant 0 : index
    %10 = vector.load %arg4[%c0_7, %c0_8] : memref<1x32xf32, #tpu.memory_space<vmem>>, vector<1x32xf32>
    %11 = vector.broadcast %10 : vector<1x32xf32> to vector<16x32xf32>
    %12 = arith.mulf %7, %11 : vector<16x32xf32>
    %cst_9 = arith.constant dense<0.000000e+00> : vector<16xf32>
    %13 = vector.multi_reduction <add>, %12, %cst_9 [1] : vector<16x32xf32> to vector<16xf32>
    %14 = vector.shape_cast %13 : vector<16xf32> to vector<16x1xf32>
    %cst_10 = arith.constant 3.125000e-02 : f32
    %15 = vector.broadcast %cst_10 : f32 to vector<16x1xf32>
    %16 = arith.mulf %9, %15 : vector<16x1xf32>
    %17 = vector.broadcast %16 : vector<16x1xf32> to vector<16x32xf32>
    %18 = arith.subf %7, %17 : vector<16x32xf32>
    %19 = arith.mulf %18, %18 : vector<16x32xf32>
    %cst_11 = arith.constant dense<0.000000e+00> : vector<16xf32>
    %20 = vector.multi_reduction <add>, %19, %cst_11 [1] : vector<16x32xf32> to vector<16xf32>
    %21 = vector.shape_cast %20 : vector<16xf32> to vector<16x1xf32>
    %cst_12 = arith.constant 3.125000e-02 : f32
    %22 = vector.broadcast %cst_12 : f32 to vector<16x1xf32>
    %23 = arith.mulf %21, %22 : vector<16x1xf32>
    %cst_13 = arith.constant 9.99999996E-13 : f32
    %24 = vector.broadcast %cst_13 : f32 to vector<16x1xf32>
    %25 = arith.addf %23, %24 : vector<16x1xf32>
    %26 = math.rsqrt %25 : vector<16x1xf32>
    %c0_14 = arith.constant 0 : index
    %27 = memref.load %arg5[%c0_14] : memref<2xf32, #tpu.memory_space<smem>>
    %c1 = arith.constant 1 : index
    %28 = memref.load %arg5[%c1] : memref<2xf32, #tpu.memory_space<smem>>
    %29 = vector.broadcast %27 : f32 to vector<16x1xf32>
    %30 = arith.mulf %16, %29 : vector<16x1xf32>
    %31 = arith.subf %14, %30 : vector<16x1xf32>
    %32 = arith.mulf %26, %31 : vector<16x1xf32>
    %33 = vector.broadcast %28 : f32 to vector<16x1xf32>
    %34 = arith.addf %32, %33 : vector<16x1xf32>
    %35 = vector.shape_cast %34 : vector<16x1xf32> to vector<1x16xf32>
    %c0_15 = arith.constant 0 : index
    %c0_16 = arith.constant 0 : index
    %36 = vector.load %arg6[%c0_15, %c0_16] : memref<1x16xf32, #tpu.memory_space<vmem>>, vector<1x16xf32>
    tpu.vector_store %arg6[%c0_15, %c0_16], %35 {strides = array<i32>} : memref<1x16xf32, #tpu.memory_space<vmem>>, vector<1x16xf32>,
    return
  }
  func.func @transform_0(%arg0: i32) -> (i32, i32) {
    %c0_i32 = arith.constant 0 : i32
    %c0_i32_0 = arith.constant 0 : i32
    return %arg0, %c0_i32 : i32, i32
  }
  func.func @transform_1(%arg0: i32) -> (i32, i32) {
    %c0_i32 = arith.constant 0 : i32
    %c0_i32_0 = arith.constant 0 : i32
    %c0_i32_1 = arith.constant 0 : i32
    return %c0_i32, %c0_i32_0 : i32, i32
  }
  func.func @transform_2(%arg0: i32) -> (i32, i32) {
    %c0_i32 = arith.constant 0 : i32
    %c0_i32_0 = arith.constant 0 : i32
    %c0_i32_1 = arith.constant 0 : i32
    return %c0_i32, %c0_i32_0 : i32, i32
  }
  func.func @transform_3(%arg0: i32) -> (i32, i32) {
    %c0_i32 = arith.constant 0 : i32
    %c0_i32_0 = arith.constant 0 : i32
    %c0_i32_1 = arith.constant 0 : i32
    return %c0_i32, %c0_i32_0 : i32, i32
  }
  func.func @transform_4(%arg0: i32) -> i32 {
    %c0_i32 = arith.constant 0 : i32
    %c0_i32_0 = arith.constant 0 : i32
    return %c0_i32 : i32
  }
  func.func @transform_5(%arg0: i32) -> (i32, i32) {
    %c0_i32 = arith.constant 0 : i32
    %c0_i32_0 = arith.constant 0 : i32
    return %c0_i32, %arg0 : i32, i32
  }
}

module attributes {stable_mosaic.version = 11 : i64} {
  func.func @_cls_pred_kernel(%arg0: i32, %arg1: memref<16x32xbf16, #tpu.memory_space<vmem>>, %arg2: memref<32x32xbf16, #tpu.memory_space<vmem>>, %arg3: memref<1x32xf32, #tpu.memory_space<vmem>>, %arg4: memref<1x32xf32, #tpu.memory_space<vmem>>, %arg5: memref<2xf32, #tpu.memory_space<smem>>, %arg6: memref<1x16xf32, #tpu.memory_space<vmem>>) attributes {dimension_semantics = [#tpu.dimension_semantics<parallel>], iteration_bounds = array<i64: 1>, scalar_prefetch = 0 : i64, scratch_operands = 0 : i64, tpu.core_type = #tpu.core_type<tc>, window_params = [{transform_indices = @transform_0, window_bounds = array<i64: 16, 32>}, {pipeline_mode = #tpu.pipeline_mode<synchronous>, transform_indices = @transform_1, window_bounds = array<i64: 32, 32>}, {pipeline_mode = #tpu.pipeline_mode<synchronous>, transform_indices = @transform_2, window_bounds = array<i64: 1, 32>}, {pipeline_mode = #tpu.pipeline_mode<synchronous>, transform_indices = @transform_3, window_bounds = array<i64: 1, 32>}, {transform_indices = @transform_4, window_bounds = array<i64: 2>}, {transform_indices = @transform_5, window_bounds = array<i64: 1, 16>}]} {
    %c0 = arith.constant 0 : index
    %c0_0 = arith.constant 0 : index
    %0 = vector.load %arg1[%c0, %c0_0] : memref<16x32xbf16, #tpu.memory_space<vmem>>, vector<16x32xbf16>
    %c0_1 = arith.constant 0 : index
    %c0_2 = arith.constant 0 : index
    %1 = vector.load %arg2[%c0_1, %c0_2] : memref<32x32xbf16, #tpu.memory_space<vmem>>, vector<32x32xbf16>
    %cst = arith.constant dense<0.000000e+00> : vector<16x32xf32>
    %2 = tpu.matmul %0, %1, %cst {dimension_numbers = #tpu.dot_dimension_numbers<[1], [0], [0], [1], [0, 0, 1, 1], [], []>} : vector<16x32xbf16>, vector<32x32xbf16>, vector<16x32xf32> -> vector<16x32xf32>
    %c0_3 = arith.constant 0 : index
    %c0_4 = arith.constant 0 : index
    %3 = vector.load %arg3[%c0_3, %c0_4] : memref<1x32xf32, #tpu.memory_space<vmem>>, vector<1x32xf32>
    %4 = vector.broadcast %3 : vector<1x32xf32> to vector<16x32xf32>
    %5 = arith.addf %2, %4 : vector<16x32xf32>
    %cst_5 = arith.constant 0.000000e+00 : f32
    %6 = vector.broadcast %cst_5 : f32 to vector<16x32xf32>
    %7 = arith.maximumf %5, %6 : vector<16x32xf32>
    %cst_6 = arith.constant dense<0.000000e+00> : vector<16xf32>
    %8 = vector.multi_reduction <add>, %7, %cst_6 [1] : vector<16x32xf32> to vector<16xf32>
    %9 = vector.shape_cast %8 : vector<16xf32> to vector<16x1xf32>
    %c0_7 = arith.constant 0 : index
    %c0_8 = arith.constant 0 : index
    %10 = vector.load %arg4[%c0_7, %c0_8] : memref<1x32xf32, #tpu.memory_space<vmem>>, vector<1x32xf32>
    %11 = vector.broadcast %10 : vector<1x32xf32> to vector<16x32xf32>
    %12 = arith.mulf %7, %11 : vector<16x32xf32>
    %cst_9 = arith.constant dense<0.000000e+00> : vector<16xf32>
    %13 = vector.multi_reduction <add>, %12, %cst_9 [1] : vector<16x32xf32> to vector<16xf32>
    %14 = vector.shape_cast %13 : vector<16xf32> to vector<16x1xf32>
    %cst_10 = arith.constant 3.125000e-02 : f32
    %15 = vector.broadcast %cst_10 : f32 to vector<16x1xf32>
    %16 = arith.mulf %9, %15 : vector<16x1xf32>
    %17 = vector.broadcast %16 : vector<16x1xf32> to vector<16x32xf32>
    %18 = arith.subf %7, %17 : vector<16x32xf32>
    %19 = arith.mulf %18, %18 : vector<16x32xf32>
    %cst_11 = arith.constant dense<0.000000e+00> : vector<16xf32>
    %20 = vector.multi_reduction <add>, %19, %cst_11 [1] : vector<16x32xf32> to vector<16xf32>
    %21 = vector.shape_cast %20 : vector<16xf32> to vector<16x1xf32>
    %cst_12 = arith.constant 3.125000e-02 : f32
    %22 = vector.broadcast %cst_12 : f32 to vector<16x1xf32>
    %23 = arith.mulf %21, %22 : vector<16x1xf32>
    %cst_13 = arith.constant 9.99999996E-13 : f32
    %24 = vector.broadcast %cst_13 : f32 to vector<16x1xf32>
    %25 = arith.addf %23, %24 : vector<16x1xf32>
    %26 = math.rsqrt %25 : vector<16x1xf32>
    %c0_14 = arith.constant 0 : index
    %27 = memref.load %arg5[%c0_14] : memref<2xf32, #tpu.memory_space<smem>>
    %c1 = arith.constant 1 : index
    %28 = memref.load %arg5[%c1] : memref<2xf32, #tpu.memory_space<smem>>
    %29 = vector.broadcast %27 : f32 to vector<16x1xf32>
    %30 = arith.mulf %16, %29 : vector<16x1xf32>
    %31 = arith.subf %14, %30 : vector<16x1xf32>
    %32 = arith.mulf %26, %31 : vector<16x1xf32>
    %33 = vector.broadcast %28 : f32 to vector<16x1xf32>
    %34 = arith.addf %32, %33 : vector<16x1xf32>
    %35 = vector.shape_cast %34 : vector<16x1xf32> to vector<1x16xf32>
    %c0_15 = arith.constant 0 : index
    %c0_16 = arith.constant 0 : index
    %36 = vector.load %arg6[%c0_15, %c0_16] : memref<1x16xf32, #tpu.memory_space<vmem>>, vector<1x16xf32>
    tpu.vector_store %arg6[%c0_15, %c0_16], %35 {strides = array<i32>} : memref<1x16xf32, #tpu.memory_space<vmem>>, vector<1x16xf32>,
    return
  }
  func.func @transform_0(%arg0: i32) -> (i32, i32) {
    %c0_i32 = arith.constant 0 : i32
    %c0_i32_0 = arith.constant 0 : i32
    return %arg0, %c0_i32 : i32, i32
  }
  func.func @transform_1(%arg0: i32) -> (i32, i32) {
    %c0_i32 = arith.constant 0 : i32
    %c0_i32_0 = arith.constant 0 : i32
    %c0_i32_1 = arith.constant 0 : i32
    return %c0_i32, %c0_i32_0 : i32, i32
  }
  func.func @transform_2(%arg0: i32) -> (i32, i32) {
    %c0_i32 = arith.constant 0 : i32
    %c0_i32_0 = arith.constant 0 : i32
    %c0_i32_1 = arith.constant 0 : i32
    return %c0_i32, %c0_i32_0 : i32, i32
  }
  func.func @transform_3(%arg0: i32) -> (i32, i32) {
    %c0_i32 = arith.constant 0 : i32
    %c0_i32_0 = arith.constant 0 : i32
    %c0_i32_1 = arith.constant 0 : i32
    return %c0_i32, %c0_i32_0 : i32, i32
  }
  func.func @transform_4(%arg0: i32) -> i32 {
    %c0_i32 = arith.constant 0 : i32
    %c0_i32_0 = arith.constant 0 : i32
    return %c0_i32 : i32
  }
  func.func @transform_5(%arg0: i32) -> (i32, i32) {
    %c0_i32 = arith.constant 0 : i32
    %c0_i32_0 = arith.constant 0 : i32
    return %c0_i32, %arg0 : i32, i32
  }
}

</mosaic_0001>

<bundles_post_ra>
// kernel: tpu_custom_call.1
= control target key start
LH: loop header
LB: loop body
LE: loop exit
PB: predicated region body
PF: predicated region fallthrough
CT: control target
= control target key end

     0   :  { %10 = vsyncpa [#allocation3], 0  ;;  %s435_s0 = inlined_call_operand.hbm [shape: bf16[16,32], index: 0, kind: input, shape index: {}]   ;;  %s436_s1 = inlined_call_operand.hbm [shape: bf16[32,32], index: 1, kind: input, shape index: {}]   ;;  %s437_s2 = inlined_call_operand.vmem [shape: f32[1,32], index: 2, kind: input, shape index: {}]   ;;  %s438_s3 = inlined_call_operand.vmem [shape: f32[1,32], index: 3, kind: input, shape index: {}]   ;;  %s439_s4 = inlined_call_operand.vmem [shape: f32[2], index: 4, kind: input, shape index: {}]   ;;  %s440_s5 = inlined_call_operand.hbm [shape: f32[1,16], index: 5, kind: output, shape index: {}]  }
   0x1   :  { %11 = vsyncpa [#allocation7], 0 }
   0x2   :  { %12 = vsyncpa [#allocation5], 0 }
   0x3   :  { %13 = vsyncpa [#allocation4], 0  ;;  %s345_s18 = smov [#allocation2]   ;;  %s259_s22 = scalar_lea.hbm %s435_s0, 128 }
   0x4   :  { %s19_s19 = sshll.u32 %s345_s18, 4  ;;  %p260_p0 = scmp.ne.s32.totalorder %s435_s0, %s259_s22  ;;  %s20_s19 = int_to_ptr.vmem [resolvable:$true] %s19_s19 }
   0x5   :  { %p263_p1 = scmp.lt.u32.totalorder %s259_s22, %s435_s0 }
   0x7   :  { %p265_p2 = pnand %p263_p1, %p260_p0 }
   0x9   :  { %268 = shalt.err (!%p265_p2)
}
   0xa   :  { %s269_s27 = scalar_lea.vmem %s20_s19, 128  ;;  %p274_p4 = scmp.lt.s32.totalorder %s20_s19, %s20_s19 }
   0xb   :  { %p270_p3 = scmp.ne.s32.totalorder %s20_s19, %s269_s27  ;;  %p275_p5 = scmp.lt.s32.totalorder %s269_s27, %s269_s27 }
   0xd   :  { %p276_p6 = por %p275_p5, %p274_p4 }
   0xf   :  { %p277_p7 = pnand %p276_p6, %p270_p3 }
  0x11   :  { %280 = shalt.err (!%p277_p7)
}
  0x12   :  { %s346_s28 = smov 64   ;;  %s347_s29 = smov 4  }
  0x13   :  { %25 = dma.hbm_to_vmem [thread:$0]  %s435_s0, 128, %s20_s19, [#allocation3], %s346_s28, %s346_s28, %s347_s29  }
  0x14   :  { %s348_s7 = smov [#allocation6]   ;;  %s48_s11 = sshll.u32 %s439_s4, 4  ;;  %s49_s11 = int_to_ptr.vmem [resolvable:$true] %s48_s11 }
  0x15   :  { %s31_s8 = sshll.u32 %s348_s7, 4  ;;  %s281_s14 = scalar_lea.hbm %s436_s1, 256  ;;  %s32_s8 = int_to_ptr.vmem [resolvable:$true] %s31_s8 }
  0x16   :  { %p282_p8 = scmp.ne.s32.totalorder %s436_s1, %s281_s14  ;;  %p285_p9 = scmp.lt.u32.totalorder %s281_s14, %s436_s1 }
  0x18   :  { %p287_p10 = pnand %p285_p9, %p282_p8 }
  0x1a   :  { %290 = shalt.err (!%p287_p10)
}
  0x1b   :  { %s291_s0 = scalar_lea.vmem %s32_s8, 256  ;;  %p296_p12 = scmp.lt.s32.totalorder %s32_s8, %s32_s8 }
  0x1c   :  { %p292_p11 = scmp.ne.s32.totalorder %s32_s8, %s291_s0  ;;  %p297_p13 = scmp.lt.s32.totalorder %s291_s0, %s291_s0 }
  0x1e   :  { %p298_p0 = por %p297_p13, %p296_p12 }
  0x20   :  { %p299_p1 = pnand %p298_p0, %p292_p11 }
  0x22   :  { %302 = shalt.err (!%p299_p1)
}
  0x23   :  { %37 = dma.hbm_to_vmem [thread:$0]  %s436_s1, 256, %s32_s8, [#allocation7], %s346_s28, %s346_s28, %s347_s29  }
  0x24   :  { %s303_s20 = scalar_lea.vmem %s49_s11, 16  ;;  %p308_p3 = scmp.lt.s32.totalorder %s49_s11, %s49_s11 }
  0x25   :  { %p304_p2 = scmp.ne.s32.totalorder %s49_s11, %s303_s20  ;;  %p309_p4 = scmp.lt.s32.totalorder %s303_s20, %s303_s20 }
  0x27   :  { %p310_p5 = por %p309_p4, %p308_p3 }
  0x29   :  { %p311_p6 = pnand %p310_p5, %p304_p2 }
  0x2b   :  { %314 = shalt.err (!%p311_p6)
}
  0x2c   :  { %s349_s21 = smov [#allocation8]  }
  0x2d   :  { %51 = dma.vmem_to_smem %s49_s11, 16, %s349_s21, [#allocation5]  }
  0x2e   :  { %337 = dma.done.wait [#allocation3], 128  }
  0x2f   :  { %338 = vsyncadd [#allocation3], 4294967168 }
  0x30   :  { %339 = dma.done.wait [#allocation7], 256  }
  0x31   :  { %340 = vsyncadd [#allocation7], 4294967040 }
  0x32   :  { %341 = dma.done.wait [#allocation5], 16  }
  0x33   :  { %342 = vsyncadd [#allocation5], 4294967280 }
  0x34   :  { %61 = sfence }
  0x35   :  { %v252_v0 = vld [vmem:[#allocation6] sm:$0xff]   ;;  %v350_v1 = vmov 0.0   ;;  %v253_v2 = vld [vmem:[#allocation6 + $0x8] sm:$0xff]   ;;  %vm351_vm0 = vmmov 0   ;;  %v254_v3 = vld [vmem:[#allocation2] sm:$0xff]   ;;  %vm93_vm1 = vcmask 261120   ;;  %v193_v37 = vlaneseq }
  0x36   :  { %236 = vmatprep.subr.bf16.mxu0 %v350_v1  ;;  %240 = vmatprep.mubr.msk.bf16.mxu0 %vm351_vm0, %v350_v1  ;;  %v226_v4 = vld [vmem:[%s437_s2] ss:$0 sm:$0xff]  ;;  %s179_s2 = sld [smem:[#allocation8]]  ;;  %s352_s25 = smov [#allocation9]   ;;  %vm204_vm2 = vcmask 130112   ;;  %vm207_vm3 = vcmask 122880  }
  0x37   :  { %237 = vmatpush3.bf16.msra.mxu0 %v252_v0  ;;  %v231_v14 = vld [vmem:[%s438_s3] ss:$0 sm:$0xff]  ;;  %s232_s3 = sld [smem:[#allocation8 + $0x1]]  ;;  %v194_v41 = vand.u32 127, %v193_v37  ;;  %v196_v46 = vshrl.u32 %v193_v37, 7  ;;  %s215_s26 = sshll.u32 %s352_s25, 4  ;;  %s216_s26 = int_to_ptr.vmem [resolvable:$true] %s215_s26 }
  0x38   :  { %238 = vmatprep.subr.bf16.mxu0 %v350_v1  ;;  %s315_s27 = scalar_lea.vmem %s216_s26, 16  ;;  %s319_s28 = scalar_lea.vmem %s216_s26, 32 }
  0x39   :  { %v199_v47 = vadd.s32 4294967288, %v194_v41  ;;  %v197_v53 = vsub.s32 %v194_v41, %v196_v46  ;;  %p316_p7 = scmp.ne.s32.totalorder %s216_s26, %s315_s27  ;;  %p320_p8 = scmp.lt.s32.totalorder %s216_s26, %s216_s26 }
  0x3a   :  { %p321_p9 = scmp.lt.s32.totalorder %s319_s28, %s315_s27 }
  0x3b   :  { %239 = vmatpush3.bf16.msra.mxu0 %v253_v2  ;;  %v202_v54 = vsub.s32 %v199_v47, %v196_v46 }
  0x3c   :  { %v181_v36 = vstv %s179_s2  ;;  %p322_p10 = por %p321_p9, %p320_p8 }
  0x3d   :  { %v188_v48 = vstv %s232_s3 }
  0x3e   :  { %241 = vmatmul.mubr.msk.bf16.vlgmr.msra.gmra.mrb[0].mxu0 %vm93_vm1, %v254_v3  ;;  %p323_p11 = pnand %p322_p10, %p316_p7 }
 0x111   :  { %v131_v5 = vpop.f32.mrb[0].mxu0 }
 0x112   :  { %v132_v6 = vadd.f32 %v226_v4, %v131_v5  ;;  %v242_v7 = vpop.f32.mrb[1].mxu0 }
 0x113   :  { %v134_v8 = vpop.f32.mrb[2].mxu0 }
 0x114   :  { %v138_v9 = vmax.f32 %v132_v6, 0.0  ;;  %v135_v10 = vadd.f32 %v226_v4, %v134_v8  ;;  %v243_v11 = vpop.f32.mrb[3].mxu0 }
 0x116   :  { %v139_v12 = vmax.f32 %v135_v10, 0.0  ;;  %v140_v13 = vsel %vm93_vm1, %v138_v9, 0.0  ;;  %v153_v16 = vmul.f32 %v231_v14, %v138_v9 }
 0x117   :  { %141 = vadd.xlane.f32.xlu0 %v140_v13 }
 0x118   :  { %v143_v15 = vsel %vm93_vm1, %v139_v12, 0.0  ;;  %v155_v17 = vsel %vm93_vm1, %v153_v16, 0.0  ;;  %v154_v28 = vmul.f32 %v231_v14, %v139_v12 }
 0x11a   :  { %v158_v29 = vsel %vm93_vm1, %v154_v28, 0.0 }
 0x11b   :  { %144 = vadd.xlane.f32.xlu0 %v143_v15 }
 0x11f   :  { %156 = vadd.xlane.f32.xlu0 %v155_v17 }
 0x1a4   :  { %v142_v18 = vpop.xlane.xlu0 %141 }
 0x1a5   :  { %v161_v19 = vmul.f32 0.03125, %v142_v18 }
 0x1a7   :  { %v163_v20 = vsub.f32 %v138_v9, %v161_v19  ;;  %v182_v39 = vmul.f32 %v181_v36, %v161_v19 }
 0x1a8   :  { %v145_v21 = vpop.xlane.xlu0 %144 }
 0x1a9   :  { %v162_v22 = vmul.f32 0.03125, %v145_v21  ;;  %v165_v23 = vmul.f32 %v163_v20, %v163_v20 }
 0x1ab   :  { %v164_v24 = vsub.f32 %v139_v12, %v162_v22  ;;  %v167_v25 = vsel %vm93_vm1, %v165_v23, 0.0  ;;  %v183_v44 = vmul.f32 %v181_v36, %v162_v22 }
 0x1ac   :  { %168 = vadd.xlane.f32.xlu1 %v167_v25  ;;  %v157_v38 = vpop.xlane.xlu0 %156 }
 0x1ad   :  { %v166_v26 = vmul.f32 %v164_v24, %v164_v24  ;;  %v184_v40 = vsub.f32 %v157_v38, %v182_v39 }
 0x1af   :  { %v170_v27 = vsel %vm93_vm1, %v166_v26, 0.0 }
 0x1b0   :  { %171 = vadd.xlane.f32.xlu1 %v170_v27 }
 0x1b4   :  { %159 = vadd.xlane.f32.xlu1 %v158_v29 }
 0x239   :  { %v169_v30 = vpop.xlane.xlu1 %168 }
 0x23a   :  { %v173_v31 = vmul.f32 0.03125, %v169_v30 }
 0x23c   :  { %v175_v32 = vadd.f32 1e-12, %v173_v31 }
 0x23d   :  { %v172_v33 = vpop.xlane.xlu1 %171 }
 0x23e   :  { %255 = vrsqrt.f32 %v175_v32  ;;  %v174_v34 = vmul.f32 0.03125, %v172_v33 }
 0x240   :  { %v176_v35 = vadd.f32 1e-12, %v174_v34 }
 0x241   :  { %v160_v43 = vpop.xlane.xlu1 %159 }
 0x242   :  { %257 = vrsqrt.f32 %v176_v35  ;;  %v185_v49 = vsub.f32 %v160_v43, %v183_v44 }
 0x248   :  { %v256_v42 = vpop.eup %255 }
 0x249   :  { %v186_v45 = vmul.f32 %v256_v42, %v184_v40 }
 0x24b   :  { %v189_v52 = vadd.f32 %v188_v48, %v186_v45 }
 0x24c   :  { %v258_v50 = vpop.eup %257 }
 0x24d   :  { %v187_v51 = vmul.f32 %v258_v50, %v185_v49  ;;  %v198_v56 = vrot.slane %v189_v52, %v197_v53 }
 0x24f   :  { %v190_v55 = vadd.f32 %v188_v48, %v187_v51 }
 0x251   :  { %v203_v57 = vrot.slane %v190_v55, %v202_v54 }
 0x253   :  { %v205_v58 = vsel %vm204_vm2, %v203_v57, %v198_v56 }
 0x254   :  { %208 = vst.msk [vmem:[#allocation9] sm:$0x1] %vm207_vm3, %v205_v58 }
 0x255   :  { %326 = shalt.err (!%p323_p11)
}
 0x256   :  { %s327_s6 = scalar_lea.hbm %s440_s5, 16 }
 0x257   :  { %p328_p12 = scmp.ne.s32.totalorder %s440_s5, %s327_s6  ;;  %p331_p13 = scmp.lt.u32.totalorder %s327_s6, %s440_s5 }
 0x259   :  { %p333_p0 = pnand %p331_p13, %p328_p12 }
 0x25b   :  { %336 = shalt.err (!%p333_p0)
}
 0x25c   :  { %218 = dma.vmem_to_hbm [thread:$0]  %s216_s26, 16, %s440_s5, [#allocation4]  }
 0x25d   :  { %343 = dma.done.wait [#allocation4], 16  }
 0x25e   :  { %344 = vsyncadd [#allocation4], 4294967280 }
 0x25f   :  { %222 = vsyncpa [#allocation3], 1 }
 0x260   :  { %223 = vsyncpa [#allocation7], 1 }
 0x261   :  { %224 = vsyncpa [#allocation4], 1 }
 0x262   :  { %225 = vsyncpa [#allocation5], 1 }

// kernel: tpu_custom_call.1
= control target key start
LH: loop header
LB: loop body
LE: loop exit
PB: predicated region body
PF: predicated region fallthrough
CT: control target
= control target key end

     0   :  { %10 = vsyncpa [#allocation3], 0  ;;  %s435_s0 = inlined_call_operand.hbm [shape: bf16[16,32], index: 0, kind: input, shape index: {}]   ;;  %s436_s1 = inlined_call_operand.hbm [shape: bf16[32,32], index: 1, kind: input, shape index: {}]   ;;  %s437_s2 = inlined_call_operand.vmem [shape: f32[1,32], index: 2, kind: input, shape index: {}]   ;;  %s438_s3 = inlined_call_operand.vmem [shape: f32[1,32], index: 3, kind: input, shape index: {}]   ;;  %s439_s4 = inlined_call_operand.vmem [shape: f32[2], index: 4, kind: input, shape index: {}]   ;;  %s440_s5 = inlined_call_operand.hbm [shape: f32[1,16], index: 5, kind: output, shape index: {}]  }
   0x1   :  { %11 = vsyncpa [#allocation7], 0 }
   0x2   :  { %12 = vsyncpa [#allocation5], 0 }
   0x3   :  { %13 = vsyncpa [#allocation4], 0  ;;  %s345_s18 = smov [#allocation2]   ;;  %s259_s22 = scalar_lea.hbm %s435_s0, 128 }
   0x4   :  { %s19_s19 = sshll.u32 %s345_s18, 4  ;;  %p260_p0 = scmp.ne.s32.totalorder %s435_s0, %s259_s22  ;;  %s20_s19 = int_to_ptr.vmem [resolvable:$true] %s19_s19 }
   0x5   :  { %p263_p1 = scmp.lt.u32.totalorder %s259_s22, %s435_s0 }
   0x7   :  { %p265_p2 = pnand %p263_p1, %p260_p0 }
   0x9   :  { %268 = shalt.err (!%p265_p2)
}
   0xa   :  { %s269_s27 = scalar_lea.vmem %s20_s19, 128  ;;  %p274_p4 = scmp.lt.s32.totalorder %s20_s19, %s20_s19 }
   0xb   :  { %p270_p3 = scmp.ne.s32.totalorder %s20_s19, %s269_s27  ;;  %p275_p5 = scmp.lt.s32.totalorder %s269_s27, %s269_s27 }
   0xd   :  { %p276_p6 = por %p275_p5, %p274_p4 }
   0xf   :  { %p277_p7 = pnand %p276_p6, %p270_p3 }
  0x11   :  { %280 = shalt.err (!%p277_p7)
}
  0x12   :  { %s346_s28 = smov 64   ;;  %s347_s29 = smov 4  }
  0x13   :  { %25 = dma.hbm_to_vmem [thread:$0]  %s435_s0, 128, %s20_s19, [#allocation3], %s346_s28, %s346_s28, %s347_s29  }
  0x14   :  { %s348_s7 = smov [#allocation6]   ;;  %s48_s11 = sshll.u32 %s439_s4, 4  ;;  %s49_s11 = int_to_ptr.vmem [resolvable:$true] %s48_s11 }
  0x15   :  { %s31_s8 = sshll.u32 %s348_s7, 4  ;;  %s281_s14 = scalar_lea.hbm %s436_s1, 256  ;;  %s32_s8 = int_to_ptr.vmem [resolvable:$true] %s31_s8 }
  0x16   :  { %p282_p8 = scmp.ne.s32.totalorder %s436_s1, %s281_s14  ;;  %p285_p9 = scmp.lt.u32.totalorder %s281_s14, %s436_s1 }
  0x18   :  { %p287_p10 = pnand %p285_p9, %p282_p8 }
  0x1a   :  { %290 = shalt.err (!%p287_p10)
}
  0x1b   :  { %s291_s0 = scalar_lea.vmem %s32_s8, 256  ;;  %p296_p12 = scmp.lt.s32.totalorder %s32_s8, %s32_s8 }
  0x1c   :  { %p292_p11 = scmp.ne.s32.totalorder %s32_s8, %s291_s0  ;;  %p297_p13 = scmp.lt.s32.totalorder %s291_s0, %s291_s0 }
  0x1e   :  { %p298_p0 = por %p297_p13, %p296_p12 }
  0x20   :  { %p299_p1 = pnand %p298_p0, %p292_p11 }
  0x22   :  { %302 = shalt.err (!%p299_p1)
}
  0x23   :  { %37 = dma.hbm_to_vmem [thread:$0]  %s436_s1, 256, %s32_s8, [#allocation7], %s346_s28, %s346_s28, %s347_s29  }
  0x24   :  { %s303_s20 = scalar_lea.vmem %s49_s11, 16  ;;  %p308_p3 = scmp.lt.s32.totalorder %s49_s11, %s49_s11 }
  0x25   :  { %p304_p2 = scmp.ne.s32.totalorder %s49_s11, %s303_s20  ;;  %p309_p4 = scmp.lt.s32.totalorder %s303_s20, %s303_s20 }
  0x27   :  { %p310_p5 = por %p309_p4, %p308_p3 }
  0x29   :  { %p311_p6 = pnand %p310_p5, %p304_p2 }
  0x2b   :  { %314 = shalt.err (!%p311_p6)
}
  0x2c   :  { %s349_s21 = smov [#allocation8]  }
  0x2d   :  { %51 = dma.vmem_to_smem %s49_s11, 16, %s349_s21, [#allocation5]  }
  0x2e   :  { %337 = dma.done.wait [#allocation3], 128  }
  0x2f   :  { %338 = vsyncadd [#allocation3], 4294967168 }
  0x30   :  { %339 = dma.done.wait [#allocation7], 256  }
  0x31   :  { %340 = vsyncadd [#allocation7], 4294967040 }
  0x32   :  { %341 = dma.done.wait [#allocation5], 16  }
  0x33   :  { %342 = vsyncadd [#allocation5], 4294967280 }
  0x34   :  { %61 = sfence }
  0x35   :  { %v252_v0 = vld [vmem:[#allocation6] sm:$0xff]   ;;  %v350_v1 = vmov 0.0   ;;  %v253_v2 = vld [vmem:[#allocation6 + $0x8] sm:$0xff]   ;;  %vm351_vm0 = vmmov 0   ;;  %v254_v3 = vld [vmem:[#allocation2] sm:$0xff]   ;;  %vm93_vm1 = vcmask 261120   ;;  %v193_v37 = vlaneseq }
  0x36   :  { %236 = vmatprep.subr.bf16.mxu0 %v350_v1  ;;  %240 = vmatprep.mubr.msk.bf16.mxu0 %vm351_vm0, %v350_v1  ;;  %v226_v4 = vld [vmem:[%s437_s2] ss:$0 sm:$0xff]  ;;  %s179_s2 = sld [smem:[#allocation8]]  ;;  %s352_s25 = smov [#allocation9]   ;;  %vm204_vm2 = vcmask 130112   ;;  %vm207_vm3 = vcmask 122880  }
  0x37   :  { %237 = vmatpush3.bf16.msra.mxu0 %v252_v0  ;;  %v231_v14 = vld [vmem:[%s438_s3] ss:$0 sm:$0xff]  ;;  %s232_s3 = sld [smem:[#allocation8 + $0x1]]  ;;  %v194_v41 = vand.u32 127, %v193_v37  ;;  %v196_v46 = vshrl.u32 %v193_v37, 7  ;;  %s215_s26 = sshll.u32 %s352_s25, 4  ;;  %s216_s26 = int_to_ptr.vmem [resolvable:$true] %s215_s26 }
  0x38   :  { %238 = vmatprep.subr.bf16.mxu0 %v350_v1  ;;  %s315_s27 = scalar_lea.vmem %s216_s26, 16  ;;  %s319_s28 = scalar_lea.vmem %s216_s26, 32 }
  0x39   :  { %v199_v47 = vadd.s32 4294967288, %v194_v41  ;;  %v197_v53 = vsub.s32 %v194_v41, %v196_v46  ;;  %p316_p7 = scmp.ne.s32.totalorder %s216_s26, %s315_s27  ;;  %p320_p8 = scmp.lt.s32.totalorder %s216_s26, %s216_s26 }
  0x3a   :  { %p321_p9 = scmp.lt.s32.totalorder %s319_s28, %s315_s27 }
  0x3b   :  { %239 = vmatpush3.bf16.msra.mxu0 %v253_v2  ;;  %v202_v54 = vsub.s32 %v199_v47, %v196_v46 }
  0x3c   :  { %v181_v36 = vstv %s179_s2  ;;  %p322_p10 = por %p321_p9, %p320_p8 }
  0x3d   :  { %v188_v48 = vstv %s232_s3 }
  0x3e   :  { %241 = vmatmul.mubr.msk.bf16.vlgmr.msra.gmra.mrb[0].mxu0 %vm93_vm1, %v254_v3  ;;  %p323_p11 = pnand %p322_p10, %p316_p7 }
 0x111   :  { %v131_v5 = vpop.f32.mrb[0].mxu0 }
 0x112   :  { %v132_v6 = vadd.f32 %v226_v4, %v131_v5  ;;  %v242_v7 = vpop.f32.mrb[1].mxu0 }
 0x113   :  { %v134_v8 = vpop.f32.mrb[2].mxu0 }
 0x114   :  { %v138_v9 = vmax.f32 %v132_v6, 0.0  ;;  %v135_v10 = vadd.f32 %v226_v4, %v134_v8  ;;  %v243_v11 = vpop.f32.mrb[3].mxu0 }
 0x116   :  { %v139_v12 = vmax.f32 %v135_v10, 0.0  ;;  %v140_v13 = vsel %vm93_vm1, %v138_v9, 0.0  ;;  %v153_v16 = vmul.f32 %v231_v14, %v138_v9 }
 0x117   :  { %141 = vadd.xlane.f32.xlu0 %v140_v13 }
 0x118   :  { %v143_v15 = vsel %vm93_vm1, %v139_v12, 0.0  ;;  %v155_v17 = vsel %vm93_vm1, %v153_v16, 0.0  ;;  %v154_v28 = vmul.f32 %v231_v14, %v139_v12 }
 0x11a   :  { %v158_v29 = vsel %vm93_vm1, %v154_v28, 0.0 }
 0x11b   :  { %144 = vadd.xlane.f32.xlu0 %v143_v15 }
 0x11f   :  { %156 = vadd.xlane.f32.xlu0 %v155_v17 }
 0x1a4   :  { %v142_v18 = vpop.xlane.xlu0 %141 }
 0x1a5   :  { %v161_v19 = vmul.f32 0.03125, %v142_v18 }
 0x1a7   :  { %v163_v20 = vsub.f32 %v138_v9, %v161_v19  ;;  %v182_v39 = vmul.f32 %v181_v36, %v161_v19 }
 0x1a8   :  { %v145_v21 = vpop.xlane.xlu0 %144 }
 0x1a9   :  { %v162_v22 = vmul.f32 0.03125, %v145_v21  ;;  %v165_v23 = vmul.f32 %v163_v20, %v163_v20 }
 0x1ab   :  { %v164_v24 = vsub.f32 %v139_v12, %v162_v22  ;;  %v167_v25 = vsel %vm93_vm1, %v165_v23, 0.0  ;;  %v183_v44 = vmul.f32 %v181_v36, %v162_v22 }
 0x1ac   :  { %168 = vadd.xlane.f32.xlu1 %v167_v25  ;;  %v157_v38 = vpop.xlane.xlu0 %156 }
 0x1ad   :  { %v166_v26 = vmul.f32 %v164_v24, %v164_v24  ;;  %v184_v40 = vsub.f32 %v157_v38, %v182_v39 }
 0x1af   :  { %v170_v27 = vsel %vm93_vm1, %v166_v26, 0.0 }
 0x1b0   :  { %171 = vadd.xlane.f32.xlu1 %v170_v27 }
 0x1b4   :  { %159 = vadd.xlane.f32.xlu1 %v158_v29 }
 0x239   :  { %v169_v30 = vpop.xlane.xlu1 %168 }
 0x23a   :  { %v173_v31 = vmul.f32 0.03125, %v169_v30 }
 0x23c   :  { %v175_v32 = vadd.f32 1e-12, %v173_v31 }
 0x23d   :  { %v172_v33 = vpop.xlane.xlu1 %171 }
 0x23e   :  { %255 = vrsqrt.f32 %v175_v32  ;;  %v174_v34 = vmul.f32 0.03125, %v172_v33 }
 0x240   :  { %v176_v35 = vadd.f32 1e-12, %v174_v34 }
 0x241   :  { %v160_v43 = vpop.xlane.xlu1 %159 }
 0x242   :  { %257 = vrsqrt.f32 %v176_v35  ;;  %v185_v49 = vsub.f32 %v160_v43, %v183_v44 }
 0x248   :  { %v256_v42 = vpop.eup %255 }
 0x249   :  { %v186_v45 = vmul.f32 %v256_v42, %v184_v40 }
 0x24b   :  { %v189_v52 = vadd.f32 %v188_v48, %v186_v45 }
 0x24c   :  { %v258_v50 = vpop.eup %257 }
 0x24d   :  { %v187_v51 = vmul.f32 %v258_v50, %v185_v49  ;;  %v198_v56 = vrot.slane %v189_v52, %v197_v53 }
 0x24f   :  { %v190_v55 = vadd.f32 %v188_v48, %v187_v51 }
 0x251   :  { %v203_v57 = vrot.slane %v190_v55, %v202_v54 }
 0x253   :  { %v205_v58 = vsel %vm204_vm2, %v203_v57, %v198_v56 }
 0x254   :  { %208 = vst.msk [vmem:[#allocation9] sm:$0x1] %vm207_vm3, %v205_v58 }
 0x255   :  { %326 = shalt.err (!%p323_p11)
}
 0x256   :  { %s327_s6 = scalar_lea.hbm %s440_s5, 16 }
 0x257   :  { %p328_p12 = scmp.ne.s32.totalorder %s440_s5, %s327_s6  ;;  %p331_p13 = scmp.lt.u32.totalorder %s327_s6, %s440_s5 }
 0x259   :  { %p333_p0 = pnand %p331_p13, %p328_p12 }
 0x25b   :  { %336 = shalt.err (!%p333_p0)
}
 0x25c   :  { %218 = dma.vmem_to_hbm [thread:$0]  %s216_s26, 16, %s440_s5, [#allocation4]  }
 0x25d   :  { %343 = dma.done.wait [#allocation4], 16  }
 0x25e   :  { %344 = vsyncadd [#allocation4], 4294967280 }
 0x25f   :  { %222 = vsyncpa [#allocation3], 1 }
 0x260   :  { %223 = vsyncpa [#allocation7], 1 }
 0x261   :  { %224 = vsyncpa [#allocation4], 1 }
 0x262   :  { %225 = vsyncpa [#allocation5], 1 }

</bundles_post_ra>
